<compile_context>
chip_gen: v6e
topology: v6e:2x2x1
jax: 0.10.0
libtpu: 0.0.40
codegen_flags: <defaults>
</compile_context>

<pallas_src>
import functools

import jax
import jax.numpy as jnp
from jax.experimental import pallas as pl
from jax.experimental.pallas import tpu as pltpu

NUM_CLASSES = 10


def _round_up(n, m):
    return ((n + m - 1) // m) * m


def _variancesig_kernel(x_ref, w_ref, b_ref, o_ref, acc_ref, *, d_rem,
                        mask_d_tail):
    # x_ref: (TB, TD) input dtype, w_ref: (TD, C) bf16, b_ref: (1, C) f32
    # o_ref: (TB, 1) f32, acc_ref: (TB, C) f32 scratch (logit accumulator)
    k = pl.program_id(1)
    k_last = pl.num_programs(1) - 1

    @pl.when(k == 0)
    def _():
        acc_ref[...] = jnp.zeros_like(acc_ref)

    x = x_ref[...]
    if mask_d_tail:
        # Last D tile reads past the end of x; zero the garbage columns so they
        # contribute nothing (W's padded rows are already exact zeros).
        limit = jnp.where(k == k_last, d_rem, x.shape[1])
        col = jax.lax.broadcasted_iota(jnp.int32, x.shape, 1)
        x = jnp.where(col < limit, x, 0.0)
    x = x.astype(jnp.bfloat16)          # single-pass bf16 MXU, f32 accumulate

    acc_ref[...] += jnp.dot(x, w_ref[...], preferred_element_type=jnp.float32)

    @pl.when(k == k_last)
    def _():
        y = jax.nn.sigmoid(acc_ref[...] + b_ref[...])          # (TB, C) f32
        s1 = jnp.sum(y, axis=1, keepdims=True)                 # (TB, 1)
        s2 = jnp.sum(y * y, axis=1, keepdims=True)             # (TB, 1)
        # sum_i (y_i - s1/10)^2 / 10  ==  (s2 - s1^2/10) / 10   (C == 10)
        o_ref[...] = (s2 - s1 * s1 * 0.1) * 0.1


def variancesig_forward(x_nchw, w, b, *, tb_max=512, td_max=4096):
    B = x_nchw.shape[0]
    D = 1
    for s in x_nchw.shape[1:]:
        D *= s

    x_flat = x_nchw.reshape(B, D)                  # no pad / no cast copy of x
    w_bf = w.astype(jnp.bfloat16)                  # tiny (D, C) cast
    b2 = b.reshape(1, NUM_CLASSES).astype(jnp.float32)

    # Batch tile: multiple of 8; for B >= 16 aim for >= 2 batch tiles so the
    # "parallel" grid axis can shard across both TensorCores on v7x.
    if B >= 16:
        tb_target = _round_up(-(-B // 2), 8)
    else:
        tb_target = _round_up(B, 8)
    TB = min(tb_max, tb_target)

    # D tile: multiple of 128 (or the full 128-rounded extent when small).
    TD = min(td_max, _round_up(D, 128))
    nk = pl.cdiv(D, TD)
    D_pad = nk * TD
    d_rem = D % TD
    mask_d_tail = d_rem != 0
    if D_pad != D:
        # Zero rows in W add nothing to the logits; (D, 10) so this is cheap.
        w_bf = jnp.pad(w_bf, ((0, D_pad - D), (0, 0)))

    grid = (pl.cdiv(B, TB), nk)

    kernel = functools.partial(
        _variancesig_kernel, d_rem=d_rem, mask_d_tail=mask_d_tail)

    return pl.pallas_call(
        kernel,
        out_shape=jax.ShapeDtypeStruct((B, 1), jnp.float32),
        grid_spec=pltpu.PrefetchScalarGridSpec(
            num_scalar_prefetch=0,
            grid=grid,
            in_specs=[
                pl.BlockSpec((TB, TD), lambda i, k: (i, k)),            # x
                pl.BlockSpec((TD, NUM_CLASSES), lambda i, k: (k, 0)),   # W
                pl.BlockSpec((1, NUM_CLASSES), lambda i, k: (0, 0)),    # b
            ],
            out_specs=pl.BlockSpec((TB, 1), lambda i, k: (i, 0)),
            scratch_shapes=[pltpu.VMEM((TB, NUM_CLASSES), jnp.float32)],
        ),
        compiler_params=pltpu.CompilerParams(
            dimension_semantics=("parallel", "arbitrary"),
            vmem_limit_bytes=32 * 1024 * 1024,
        ),
    )(x_flat, w_bf, b2)


def _reference(x_nchw, w, b):
    B = x_nchw.shape[0]
    x_flat = x_nchw.reshape(B, -1).astype(jnp.float32)
    y = jax.nn.sigmoid(x_flat @ w + b[None, :])
    y = y - jnp.sum(y, axis=1, keepdims=True) / 10.0
    return jnp.sum(y * y, axis=1, keepdims=True) / 10.0


if __name__ == "__main__":
    key = jax.random.PRNGKey(0)
    kx, kw, kb = jax.random.split(key, 3)

    B, C, H, W = 2, 4, 16, 16          # small NCHW input
    D = C * H * W                      # 1024

    x = jax.random.normal(kx, (B, C, H, W), dtype=jnp.float32)
    # Deterministic synthetic "model" parameters (linear D -> 10 classes).
    w = jax.random.normal(kw, (D, NUM_CLASSES), dtype=jnp.float32) * 0.05
    b = jax.random.normal(kb, (NUM_CLASSES,), dtype=jnp.float32) * 0.1

    out = variancesig_forward(x, w, b)
    out = jax.block_until_ready(out)

    ref = _reference(x, w, b)
    assert out.shape == (B, 1), out.shape
    # bf16 matmul inputs (f32 accumulation + f32 epilogue): relaxed tolerance.
    assert jnp.allclose(out, ref, atol=2e-3, rtol=3e-2), (out, ref)

    print("KERNEL_OK")
</pallas_src>

<mosaic_0001>
module attributes {stable_mosaic.version = 11 : i64} {
  func.func @_variancesig_kernel(%arg0: i32, %arg1: i32, %arg2: memref<8x1024xf32, #tpu.memory_space<vmem>>, %arg3: memref<1024x10xbf16, #tpu.memory_space<vmem>>, %arg4: memref<1x10xf32, #tpu.memory_space<vmem>>, %arg5: memref<8x1xf32, #tpu.memory_space<vmem>>, %arg6: memref<8x10xf32, #tpu.memory_space<vmem>>) attributes {dimension_semantics = [#tpu.dimension_semantics<parallel>, #tpu.dimension_semantics<arbitrary>], iteration_bounds = array<i64: 1, 1>, scalar_prefetch = 0 : i64, scratch_operands = 1 : i64, tpu.core_type = #tpu.core_type<tc>, window_params = [{transform_indices = @transform_0, window_bounds = array<i64: 8, 1024>}, {transform_indices = @transform_1, window_bounds = array<i64: 1024, 10>}, {pipeline_mode = #tpu.pipeline_mode<synchronous>, transform_indices = @transform_2, window_bounds = array<i64: 1, 10>}, {transform_indices = @transform_3, window_bounds = array<i64: 8, 1>}]} {
    %c0_i32 = arith.constant 0 : i32
    %0 = arith.cmpi eq, %arg1, %c0_i32 : i32
    %1 = arith.extui %0 : i1 to i32
    %c0_i32_0 = arith.constant 0 : i32
    %2 = arith.cmpi ne, %1, %c0_i32_0 : i32
    scf.if %2 {
      %cst_10 = arith.constant 0.000000e+00 : f32
      %13 = vector.broadcast %cst_10 : f32 to vector<8x10xf32>
      %c0_11 = arith.constant 0 : index
      %c0_12 = arith.constant 0 : index
      %14 = vector.load %arg6[%c0_11, %c0_12] : memref<8x10xf32, #tpu.memory_space<vmem>>, vector<8x10xf32>
      tpu.vector_store %arg6[%c0_11, %c0_12], %13 {strides = array<i32>} : memref<8x10xf32, #tpu.memory_space<vmem>>, vector<8x10xf32>,
    } else {
    }
    %c0 = arith.constant 0 : index
    %c0_1 = arith.constant 0 : index
    %3 = vector.load %arg2[%c0, %c0_1] : memref<8x1024xf32, #tpu.memory_space<vmem>>, vector<8x1024xf32>
    %4 = arith.truncf %3 : vector<8x1024xf32> to vector<8x1024xbf16>
    %c0_2 = arith.constant 0 : index
    %c0_3 = arith.constant 0 : index
    %5 = vector.load %arg6[%c0_2, %c0_3] : memref<8x10xf32, #tpu.memory_space<vmem>>, vector<8x10xf32>
    %c0_4 = arith.constant 0 : index
    %c0_5 = arith.constant 0 : index
    %6 = vector.load %arg3[%c0_4, %c0_5] : memref<1024x10xbf16, #tpu.memory_space<vmem>>, vector<1024x10xbf16>
    %cst = arith.constant dense<0.000000e+00> : vector<8x10xf32>
    %7 = tpu.matmul %4, %6, %cst {dimension_numbers = #tpu.dot_dimension_numbers<[1], [0], [0], [1], [0, 0, 1, 1], [], []>} : vector<8x1024xbf16>, vector<1024x10xbf16>, vector<8x10xf32> -> vector<8x10xf32>
    %8 = arith.addf %5, %7 : vector<8x10xf32>
    %c0_6 = arith.constant 0 : index
    %c0_7 = arith.constant 0 : index
    %9 = vector.load %arg6[%c0_6, %c0_7] : memref<8x10xf32, #tpu.memory_space<vmem>>, vector<8x10xf32>
    tpu.vector_store %arg6[%c0_6, %c0_7], %8 {strides = array<i32>} : memref<8x10xf32, #tpu.memory_space<vmem>>, vector<8x10xf32>,
    %c0_i32_8 = arith.constant 0 : i32
    %10 = arith.cmpi eq, %arg1, %c0_i32_8 : i32
    %11 = arith.extui %10 : i1 to i32
    %c0_i32_9 = arith.constant 0 : i32
    %12 = arith.cmpi ne, %11, %c0_i32_9 : i32
    scf.if %12 {
      %c0_10 = arith.constant 0 : index
      %c0_11 = arith.constant 0 : index
      %13 = vector.load %arg6[%c0_10, %c0_11] : memref<8x10xf32, #tpu.memory_space<vmem>>, vector<8x10xf32>
      %c0_12 = arith.constant 0 : index
      %c0_13 = arith.constant 0 : index
      %14 = vector.load %arg4[%c0_12, %c0_13] : memref<1x10xf32, #tpu.memory_space<vmem>>, vector<1x10xf32>
      %15 = vector.broadcast %14 : vector<1x10xf32> to vector<8x10xf32>
      %16 = arith.addf %13, %15 : vector<8x10xf32>
      %17 = arith.negf %16 : vector<8x10xf32>
      %18 = math.exp %17 : vector<8x10xf32>
      %cst_14 = arith.constant 1.000000e+00 : f32
      %19 = vector.broadcast %cst_14 : f32 to vector<8x10xf32>
      %20 = arith.addf %19, %18 : vector<8x10xf32>
      %21 = arith.divf %19, %20 : vector<8x10xf32>
      %cst_15 = arith.constant dense<0.000000e+00> : vector<8xf32>
      %22 = vector.multi_reduction <add>, %21, %cst_15 [1] : vector<8x10xf32> to vector<8xf32>
      %23 = vector.shape_cast %22 : vector<8xf32> to vector<8x1xf32>
      %24 = arith.mulf %21, %21 : vector<8x10xf32>
      %cst_16 = arith.constant dense<0.000000e+00> : vector<8xf32>
      %25 = vector.multi_reduction <add>, %24, %cst_16 [1] : vector<8x10xf32> to vector<8xf32>
      %26 = vector.shape_cast %25 : vector<8xf32> to vector<8x1xf32>
      %27 = arith.mulf %23, %23 : vector<8x1xf32>
      %cst_17 = arith.constant 1.000000e-01 : f32
      %28 = vector.broadcast %cst_17 : f32 to vector<8x1xf32>
      %29 = arith.mulf %27, %28 : vector<8x1xf32>
      %30 = arith.subf %26, %29 : vector<8x1xf32>
      %cst_18 = arith.constant 1.000000e-01 : f32
      %31 = vector.broadcast %cst_18 : f32 to vector<8x1xf32>
      %32 = arith.mulf %30, %31 : vector<8x1xf32>
      %c0_19 = arith.constant 0 : index
      %c0_20 = arith.constant 0 : index
      %33 = vector.load %arg5[%c0_19, %c0_20] : memref<8x1xf32, #tpu.memory_space<vmem>>, vector<8x1xf32>
      tpu.vector_store %arg5[%c0_19, %c0_20], %32 {strides = array<i32>} : memref<8x1xf32, #tpu.memory_space<vmem>>, vector<8x1xf32>,
    } else {
    }
    return
  }
  func.func @transform_0(%arg0: i32, %arg1: i32) -> (i32, i32) {
    %c0_i32 = arith.constant 0 : i32
    return %arg0, %arg1 : i32, i32
  }
  func.func @transform_1(%arg0: i32, %arg1: i32) -> (i32, i32) {
    %c0_i32 = arith.constant 0 : i32
    %c0_i32_0 = arith.constant 0 : i32
    return %arg1, %c0_i32 : i32, i32
  }
  func.func @transform_2(%arg0: i32, %arg1: i32) -> (i32, i32) {
    %c0_i32 = arith.constant 0 : i32
    %c0_i32_0 = arith.constant 0 : i32
    %c0_i32_1 = arith.constant 0 : i32
    return %c0_i32, %c0_i32_0 : i32, i32
  }
  func.func @transform_3(%arg0: i32, %arg1: i32) -> (i32, i32) {
    %c0_i32 = arith.constant 0 : i32
    %c0_i32_0 = arith.constant 0 : i32
    return %arg0, %c0_i32 : i32, i32
  }
}

</mosaic_0001>

<bundles_post_ra>
// kernel: tpu_custom_call.1
= control target key start
LH: loop header
LB: loop body
LE: loop exit
PB: predicated region body
PF: predicated region fallthrough
CT: control target
= control target key end

     0   :  { %v44_v30 = vlaneseq  ;;  %v1109_v35 = vmov 1983009808   ;;  %vm19_vm0 = vcmask 80896   ;;  %vm830_vm1 = vcmask 7168   ;;  %s1367_s0 = inlined_call_operand.vmem [shape: f32[2,1024], index: 0, kind: input, shape index: {}]   ;;  %s1368_s1 = inlined_call_operand.vmem [shape: bf16[1024,10], index: 1, kind: input, shape index: {}]   ;;  %s1369_s2 = inlined_call_operand.vmem [shape: f32[1,10], index: 2, kind: input, shape index: {}]   ;;  %s1370_s3 = inlined_call_operand.vmem [shape: f32[2,1], index: 3, kind: output, shape index: {}]  }
   0x1   :  { %v1029_v0 = vld [vmem:[%s1368_s1 + $0x78] sm:$0xff]   ;;  %v1033_v4 = vld [vmem:[%s1368_s1 + $0x70] sm:$0xff]   ;;  %v1037_v8 = vld [vmem:[%s1368_s1 + $0x68] sm:$0xff]   ;;  %v42_v36 = vunpack.c.l.s4 %v1109_v35 }
   0x2   :  { %v1030_v1 = vld [vmem:[%s1368_s1 + $0xf8] sm:$0xff]   ;;  %939 = vmatprep.subr.bf16.mxu0 %v1029_v0  ;;  %v1034_v5 = vld [vmem:[%s1368_s1 + $0xf0] sm:$0xff]   ;;  %v1038_v9 = vld [vmem:[%s1368_s1 + $0xe8] sm:$0xff]   ;;  %v45_v37 = vshrl.u32 %v44_v30, 7 }
   0x3   :  { %v1031_v2 = vld [vmem:[%s1368_s1 + $0x38] sm:$0xff]   ;;  %961 = vmatprep.subr.bf16.mxu1 %v1030_v1  ;;  %v1035_v6 = vld [vmem:[%s1368_s1 + $0x30] sm:$0xff]   ;;  %v1039_v10 = vld [vmem:[%s1368_s1 + $0x28] sm:$0xff]   ;;  %v43_v40 = vunpack.c.0.s8 %v42_v36 }
   0x4   :  { %v1032_v3 = vld [vmem:[%s1368_s1 + $0xb8] sm:$0xff]   ;;  %940 = vmatpush3.bf16.msra.mxu0 %v1031_v2  ;;  %v1036_v7 = vld [vmem:[%s1368_s1 + $0xb0] sm:$0xff]   ;;  %v1040_v11 = vld [vmem:[%s1368_s1 + $0xa8] sm:$0xff]  }
   0x5   :  { %962 = vmatpush3.bf16.msra.mxu1 %v1032_v3  ;;  %941 = vmatprep.subr.bf16.mxu0 %v1033_v4  ;;  %v1041_v12 = vld [vmem:[%s1368_s1 + $0x60] sm:$0xff]   ;;  %v1045_v16 = vld [vmem:[%s1368_s1 + $0x58] sm:$0xff]   ;;  %v1049_v20 = vld [vmem:[%s1368_s1 + $0x50] sm:$0xff]   ;;  %v1245_v43 = vsub.s32 %v43_v40, %v45_v37 }
   0x6   :  { %963 = vmatprep.subr.bf16.mxu1 %v1034_v5  ;;  %v1042_v13 = vld [vmem:[%s1368_s1 + $0xe0] sm:$0xff]   ;;  %v1046_v17 = vld [vmem:[%s1368_s1 + $0xd8] sm:$0xff]   ;;  %v1050_v21 = vld [vmem:[%s1368_s1 + $0xd0] sm:$0xff]  }
   0x7   :  { %v1043_v14 = vld [vmem:[%s1368_s1 + $0x20] sm:$0xff]   ;;  %v1047_v18 = vld [vmem:[%s1368_s1 + $0x18] sm:$0xff]   ;;  %v1051_v22 = vld [vmem:[%s1368_s1 + $0x10] sm:$0xff]  }
   0x8   :  { %942 = vmatpush3.bf16.msra.mxu0 %v1035_v6  ;;  %v1044_v15 = vld [vmem:[%s1368_s1 + $0xa0] sm:$0xff]   ;;  %v1048_v19 = vld [vmem:[%s1368_s1 + $0x98] sm:$0xff]   ;;  %v1052_v23 = vld [vmem:[%s1368_s1 + $0x90] sm:$0xff]  }
   0x9   :  { %964 = vmatpush3.bf16.msra.mxu1 %v1036_v7  ;;  %943 = vmatprep.subr.bf16.mxu0 %v1037_v8  ;;  %v1053_v24 = vld [vmem:[%s1368_s1 + $0x48] sm:$0xff]   ;;  %v1057_v28 = vld [vmem:[%s1368_s1 + $0x40] sm:$0xff]   ;;  %v1067_v41 = vld [vmem:[%s1368_s1 + $0x178] sm:$0xff]  }
   0xa   :  { %965 = vmatprep.subr.bf16.mxu1 %v1038_v9  ;;  %v1054_v25 = vld [vmem:[%s1368_s1 + $0xc8] sm:$0xff]   ;;  %v1058_v29 = vld [vmem:[%s1368_s1 + $0xc0] sm:$0xff]   ;;  %v1068_v42 = vld [vmem:[%s1368_s1 + $0x1f8] sm:$0xff]  }
   0xb   :  { %v1055_v26 = vld [vmem:[%s1368_s1 + $0x8] sm:$0xff]   ;;  %v1059_v31 = vld [vmem:[%s1368_s1] sm:$0xff]   ;;  %v1069_v52 = vld [vmem:[%s1368_s1 + $0x138] sm:$0xff]  }
   0xc   :  { %944 = vmatpush3.bf16.msra.mxu0 %v1039_v10  ;;  %v1056_v27 = vld [vmem:[%s1368_s1 + $0x88] sm:$0xff]   ;;  %v1060_v32 = vld [vmem:[%s1368_s1 + $0x80] sm:$0xff]   ;;  %v1070_v53 = vld [vmem:[%s1368_s1 + $0x1b8] sm:$0xff]  }
   0xd   :  { %966 = vmatpush3.bf16.msra.mxu1 %v1040_v11  ;;  %945 = vmatprep.subr.bf16.mxu0 %v1041_v12  ;;  %v1061_v33 = vld [vmem:[%s1367_s0] ss:$16 sps:$4 sm:$0xff]   ;;  %v1065_v38 = vld [vmem:[%s1367_s0 + $0x4] ss:$16 sps:$4 sm:$0xff]   ;;  %v1075_v62 = vld [vmem:[%s1368_s1 + $0x168] sm:$0xff]  }
   0xe   :  { %967 = vmatprep.subr.bf16.mxu1 %v1042_v13  ;;  %v1063_v34 = vld [vmem:[%s1367_s0 + $0x20] ss:$16 sps:$4 sm:$0xff]   ;;  %v1066_v39 = vld [vmem:[%s1367_s0 + $0x24] ss:$16 sps:$4 sm:$0xff]   ;;  %v47_v44 = vrot.slane %v1061_v33, %v1245_v43  ;;  %v54_v46 = vrot.slane %v1065_v38, %v1245_v43  ;;  %v1076_v63 = vld [vmem:[%s1368_s1 + $0x1e8] sm:$0xff]   ;;  %v1110_v38 = vmov 0.0  }
   0xf   :  { %v61_v45 = vrot.slane %v1063_v34, %v1245_v43  ;;  %v68_v47 = vrot.slane %v1066_v39, %v1245_v43  ;;  %v1071_v58 = vld [vmem:[%s1368_s1 + $0x170] sm:$0xff]   ;;  %v1077_v0 = vld [vmem:[%s1368_s1 + $0x128] sm:$0xff]   ;;  %v1079_v2 = vld [vmem:[%s1368_s1 + $0x160] sm:$0xff]   ;;  %20 = vst.msk [vmem:[#allocation2] sm:$0xff] %vm19_vm0, %v1110_v38 }
  0x10   :  { %946 = vmatpush3.bf16.msra.mxu0 %v1043_v14  ;;  %v1072_v59 = vld [vmem:[%s1368_s1 + $0x1f0] sm:$0xff]   ;;  %v1078_v1 = vld [vmem:[%s1368_s1 + $0x1a8] sm:$0xff]   ;;  %v1080_v3 = vld [vmem:[%s1368_s1 + $0x1e0] sm:$0xff]  }
  0x11   :  { %968 = vmatpush3.bf16.msra.mxu1 %v1044_v15  ;;  %947 = vmatprep.subr.bf16.mxu0 %v1045_v16  ;;  %v70_v48 = vcombine.high %v47_v44, %v61_v45  ;;  %v72_v49 = vcombine.high %v54_v46, %v68_v47  ;;  %v69_v50 = vcombine.low %v47_v44, %v61_v45  ;;  %v1073_v60 = vld [vmem:[%s1368_s1 + $0x130] sm:$0xff]   ;;  %v1081_v4 = vld [vmem:[%s1368_s1 + $0x120] sm:$0xff]   ;;  %v1083_v6 = vld [vmem:[%s1368_s1 + $0x158] sm:$0xff]  }
  0x12   :  { %969 = vmatprep.subr.bf16.mxu1 %v1046_v17  ;;  %v71_v51 = vcombine.low %v54_v46, %v68_v47  ;;  %v1074_v61 = vld [vmem:[%s1368_s1 + $0x1b0] sm:$0xff]   ;;  %v1082_v5 = vld [vmem:[%s1368_s1 + $0x1a0] sm:$0xff]   ;;  %v1084_v7 = vld [vmem:[%s1368_s1 + $0x1d8] sm:$0xff]  }
  0x13   :  { %v118_v54 = vpack.c.bf16 %v70_v48, %v70_v48  ;;  %v120_v55 = vpack.c.bf16 %v72_v49, %v72_v49  ;;  %v117_v56 = vpack.c.bf16 %v69_v50, %v69_v50  ;;  %v1085_v8 = vld [vmem:[%s1368_s1 + $0x118] sm:$0xff]   ;;  %v1087_v10 = vld [vmem:[%s1368_s1 + $0x150] sm:$0xff]   ;;  %v1091_v14 = vld [vmem:[%s1368_s1 + $0x148] sm:$0xff]  }
  0x14   :  { %948 = vmatpush3.bf16.msra.mxu0 %v1047_v18  ;;  %v119_v57 = vpack.c.bf16 %v71_v51, %v71_v51  ;;  %v1086_v9 = vld [vmem:[%s1368_s1 + $0x198] sm:$0xff]   ;;  %v1088_v11 = vld [vmem:[%s1368_s1 + $0x1d0] sm:$0xff]   ;;  %v1092_v15 = vld [vmem:[%s1368_s1 + $0x1c8] sm:$0xff]  }
  0x15   :  { %970 = vmatpush3.bf16.msra.mxu1 %v1048_v19  ;;  %949 = vmatprep.subr.bf16.mxu0 %v1049_v20  ;;  %v1089_v12 = vld [vmem:[%s1368_s1 + $0x110] sm:$0xff]   ;;  %v1093_v16 = vld [vmem:[%s1368_s1 + $0x108] sm:$0xff]   ;;  %v1095_v18 = vld [vmem:[%s1368_s1 + $0x140] sm:$0xff]  }
  0x16   :  { %971 = vmatprep.subr.bf16.mxu1 %v1050_v21  ;;  %670 = vmatprep.mubr.bf16.mxu0 %v118_v54  ;;  %v1090_v13 = vld [vmem:[%s1368_s1 + $0x190] sm:$0xff]   ;;  %v1094_v17 = vld [vmem:[%s1368_s1 + $0x188] sm:$0xff]   ;;  %v1096_v19 = vld [vmem:[%s1368_s1 + $0x1c0] sm:$0xff]  }
  0x17   :  { %710 = vmatprep.mubr.bf16.mxu1 %v120_v55  ;;  %v1099_v20 = vld [vmem:[%s1367_s0 + $0x8] ss:$16 sps:$4 sm:$0xff]  }
  0x18   :  { %950 = vmatpush3.bf16.msra.mxu0 %v1051_v22  ;;  %v1101_v21 = vld [vmem:[%s1367_s0 + $0x28] ss:$16 sps:$4 sm:$0xff]   ;;  %v1103_v22 = vld [vmem:[%s1367_s0 + $0xc] ss:$16 sps:$4 sm:$0xff]  }
  0x19   :  { %972 = vmatpush3.bf16.msra.mxu1 %v1052_v23  ;;  %951 = vmatprep.subr.bf16.mxu0 %v1053_v24  ;;  %v1104_v23 = vld [vmem:[%s1367_s0 + $0x2c] ss:$16 sps:$4 sm:$0xff]   ;;  %v83_v24 = vrot.slane %v1099_v20, %v1245_v43 }
  0x1a   :  { %973 = vmatprep.subr.bf16.mxu1 %v1054_v25  ;;  %v97_v25 = vrot.slane %v1101_v21, %v1245_v43 }
  0x1c   :  { %952 = vmatpush3.bf16.msra.mxu0 %v1055_v26  ;;  %v90_v26 = vrot.slane %v1103_v22, %v1245_v43  ;;  %v106_v30 = vcombine.high %v83_v24, %v97_v25 }
  0x1d   :  { %974 = vmatpush3.bf16.msra.mxu1 %v1056_v27  ;;  %953 = vmatprep.subr.bf16.mxu0 %v1057_v28  ;;  %v1097_v27 = vld [vmem:[%s1368_s1 + $0x100] sm:$0xff]  }
  0x1e   :  { %975 = vmatprep.subr.bf16.mxu1 %v1058_v29  ;;  %v1098_v28 = vld [vmem:[%s1368_s1 + $0x180] sm:$0xff]   ;;  %v104_v29 = vrot.slane %v1104_v23, %v1245_v43  ;;  %v122_v34 = vpack.c.bf16 %v106_v30, %v106_v30 }
  0x20   :  { %954 = vmatpush3.bf16.msra.mxu0 %v1059_v31  ;;  %v105_v31 = vcombine.low %v83_v24, %v97_v25  ;;  %v107_v33 = vcombine.low %v90_v26, %v104_v29 }
  0x21   :  { %976 = vmatpush3.bf16.msra.mxu1 %v1060_v32  ;;  %983 = vmatprep.subr.bf16.mxu0 %v1067_v41  ;;  %v108_v32 = vcombine.high %v90_v26, %v104_v29 }
  0x22   :  { %1005 = vmatprep.subr.bf16.mxu1 %v1068_v42  ;;  %v121_v35 = vpack.c.bf16 %v105_v31, %v105_v31  ;;  %v123_v37 = vpack.c.bf16 %v107_v33, %v107_v33 }
  0x23   :  { %671 = vmatmul.mubr.bf16.vlgmr.msra.gmra.mxu0 %v117_v56  ;;  %v124_v36 = vpack.c.bf16 %v108_v32, %v108_v32 }
  0x24   :  { %711 = vmatmul.mubr.bf16.vlgmr.msra.gmra.mxu1 %v119_v57  ;;  %984 = vmatpush3.bf16.msra.mxu0 %v1069_v52 }
  0x25   :  { %1006 = vmatpush3.bf16.msra.mxu1 %v1070_v53  ;;  %985 = vmatprep.subr.bf16.mxu0 %v1071_v58 }
  0x26   :  { %1007 = vmatprep.subr.bf16.mxu1 %v1072_v59  ;;  %750 = vmatprep.mubr.bf16.mxu0 %v122_v34 }
  0x27   :  { %790 = vmatprep.mubr.bf16.mxu1 %v124_v36 }
  0x28   :  { %986 = vmatpush3.bf16.msra.mxu0 %v1073_v60 }
  0x29   :  { %1008 = vmatpush3.bf16.msra.mxu1 %v1074_v61  ;;  %987 = vmatprep.subr.bf16.mxu0 %v1075_v62  ;;  %v125_v61 = vld [vmem:[#allocation2] sm:$0xff] }
  0x2a   :  { %1009 = vmatprep.subr.bf16.mxu1 %v1076_v63 }
  0x2c   :  { %988 = vmatpush3.bf16.msra.mxu0 %v1077_v0  ;;  %v937_v0 = vld [vmem:[%s1369_s2] ss:$0 sm:$0xff] }
  0x2d   :  { %1010 = vmatpush3.bf16.msra.mxu1 %v1078_v1  ;;  %989 = vmatprep.subr.bf16.mxu0 %v1079_v2 }
  0x2e   :  { %1011 = vmatprep.subr.bf16.mxu1 %v1080_v3 }
  0x30   :  { %990 = vmatpush3.bf16.msra.mxu0 %v1081_v4 }
  0x31   :  { %1012 = vmatpush3.bf16.msra.mxu1 %v1082_v5  ;;  %991 = vmatprep.subr.bf16.mxu0 %v1083_v6 }
  0x32   :  { %1013 = vmatprep.subr.bf16.mxu1 %v1084_v7 }
  0x34   :  { %992 = vmatpush3.bf16.msra.mxu0 %v1085_v8 }
  0x35   :  { %1014 = vmatpush3.bf16.msra.mxu1 %v1086_v9  ;;  %993 = vmatprep.subr.bf16.mxu0 %v1087_v10 }
  0x36   :  { %1015 = vmatprep.subr.bf16.mxu1 %v1088_v11 }
  0x38   :  { %994 = vmatpush3.bf16.msra.mxu0 %v1089_v12 }
  0x39   :  { %1016 = vmatpush3.bf16.msra.mxu1 %v1090_v13  ;;  %995 = vmatprep.subr.bf16.mxu0 %v1091_v14 }
  0x3a   :  { %1017 = vmatprep.subr.bf16.mxu1 %v1092_v15 }
  0x3c   :  { %996 = vmatpush3.bf16.msra.mxu0 %v1093_v16 }
  0x3d   :  { %1018 = vmatpush3.bf16.msra.mxu1 %v1094_v17  ;;  %997 = vmatprep.subr.bf16.mxu0 %v1095_v18 }
  0x3e   :  { %1019 = vmatprep.subr.bf16.mxu1 %v1096_v19 }
  0x40   :  { %998 = vmatpush3.bf16.msra.mxu0 %v1097_v27 }
  0x41   :  { %1020 = vmatpush3.bf16.msra.mxu1 %v1098_v28 }
  0x43   :  { %751 = vmatmul.mubr.bf16.vlgmr.msra.gmra.mxu0 %v121_v35 }
  0x44   :  { %791 = vmatmul.mubr.bf16.vlgmr.msra.gmra.mxu1 %v123_v37 }
  0xe3   :  { %v955_v39 = vpop.f32.mrf.mxu0 }
  0xe4   :  { %v977_v40 = vpop.f32.mrf.mxu1 }
  0xe5   :  { %v956_v41 = vpop.f32.mrf.mxu0 }
  0xe6   :  { %v978_v42 = vpop.f32.mrf.mxu1  ;;  %v957_v47 = vadd.f32 %v956_v41, %v955_v39 }
  0xe7   :  { %v958_v43 = vpop.f32.mrf.mxu0  ;;  %v979_v48 = vadd.f32 %v978_v42, %v977_v40 }
  0xe8   :  { %v980_v44 = vpop.f32.mrf.mxu1 }
  0xe9   :  { %v959_v45 = vpop.f32.mrf.mxu0  ;;  %v713_v53 = vadd.f32 %v979_v48, %v957_v47 }
  0xea   :  { %v981_v46 = vpop.f32.mrf.mxu1 }
 0x103   :  { %v999_v49 = vpop.f32.mrf.mxu0 }
 0x104   :  { %v1021_v50 = vpop.f32.mrf.mxu1 }
 0x105   :  { %v1000_v51 = vpop.f32.mrf.mxu0 }
 0x106   :  { %v1022_v52 = vpop.f32.mrf.mxu1  ;;  %v1001_v54 = vadd.f32 %v1000_v51, %v999_v49 }
 0x107   :  { %v1002_v55 = vpop.f32.mrf.mxu0  ;;  %v1023_v58 = vadd.f32 %v1022_v52, %v1021_v50 }
 0x108   :  { %v1024_v56 = vpop.f32.mrf.mxu1  ;;  %v753_v57 = vadd.f32 %v1001_v54, %v713_v53 }
 0x109   :  { %v1003_v59 = vpop.f32.mrf.mxu0 }
 0x10a   :  { %v1025_v60 = vpop.f32.mrf.mxu1  ;;  %v793_v62 = vadd.f32 %v1023_v58, %v753_v57 }
 0x10c   :  { %v798_v63 = vadd.f32 %v793_v62, %v125_v61 }
 0x10e   :  { %800 = vst.msk [vmem:[#allocation2] sm:$0xff] %vm19_vm0, %v798_v63 }
 0x115   :  { %v804_v1 = vld [vmem:[#allocation2] sm:$0xff] }
 0x116   :  { %v812_v2 = vadd.f32 %v937_v0, %v804_v1 }
 0x118   :  { %v938_v3 = vmul.f32 -1.442695, %v812_v2 }
 0x11a   :  { %1105 = vpow2.f32 %v938_v3 }
 0x127   :  { %v1106_v4 = vpop.eup %1105 }
 0x128   :  { %v816_v5 = vadd.f32 1.0, %v1106_v4 }
 0x12a   :  { %1107 = vrcp.f32 %v816_v5 }
 0x137   :  { %v1108_v6 = vpop.eup %1107 }
 0x138   :  { %v819_v7 = vsel %vm19_vm0, %v1108_v6, 0.0  ;;  %v822_v8 = vmul.f32 %v1108_v6, %v1108_v6 }
 0x139   :  { %820 = vadd.xlane.f32.xlu0 %v819_v7 }
 0x13a   :  { %v823_v9 = vsel %vm19_vm0, %v822_v8, 0.0 }
 0x13d   :  { %824 = vadd.xlane.f32.xlu0 %v823_v9 }
 0x1c2   :  { %v821_v10 = vpop.xlane.xlu0 %820 }
 0x1c3   :  { %v826_v11 = vmul.f32 %v821_v10, %v821_v10 }
 0x1c5   :  { %v827_v12 = vmul.f32 0.1, %v826_v11 }
 0x1c6   :  { %v825_v13 = vpop.xlane.xlu0 %824 }
 0x1c7   :  { %v828_v14 = vsub.f32 %v825_v13, %v827_v12 }
 0x1c9   :  { %v829_v15 = vmul.f32 0.1, %v828_v14 }
 0x1cb   :  { %831 = vst.msk [vmem:[#allocation3] sm:$0xff] %vm830_vm1, %v829_v15 }
 0x1d2   :  { %v850_v16 = vld [vmem:[#allocation3] sm:$0x3] }
 0x1d3   :  { %851 = vst [vmem:[%s1370_s3] sm:$0x3] %v850_v16 }

</bundles_post_ra>
